<compile_context>
chip_gen: v6e
topology: v6e:2x2x1
jax: 0.10.0
libtpu: 0.0.40
codegen_flags: <defaults>
</compile_context>

<pallas_src>
import jax
import jax.numpy as jnp
from jax.experimental import pallas as pl
from jax.experimental.pallas import tpu as pltpu


def _attn_kernel(x_ref, w_ref, o_ref):
    # x_ref: (BLOCK_B, T, D) VMEM tile of the inputs
    # w_ref: (1, D)          attention vector, resident in VMEM for all steps
    # o_ref: (BLOCK_B, T)    normalized attention weights
    x = x_ref[...].astype(jnp.float32)               # (BB, T, D)
    w = w_ref[...].astype(jnp.float32)                # (1, D) broadcasts over (BB, T, D)
    # scores[b, t] = tanh( sum_d x[b, t, d] * w[d] ): VPU mul, XLU lane-reduce, EUP tanh
    scores = jnp.tanh(jnp.sum(x * w, axis=-1))        # (BB, T) f32
    # numerically-stable softmax over the sequence axis, batched over BLOCK_B
    m = jnp.max(scores, axis=-1, keepdims=True)       # (BB, 1)
    e = jnp.exp(scores - m)                            # EUP
    denom = jnp.sum(e, axis=-1, keepdims=True)         # (BB, 1)
    inv = pl.reciprocal(denom, approx=True)            # EUP vrcp - essentially free
    o_ref[...] = (e * inv).astype(o_ref.dtype)


def _pick_block_b(B, T, D, itemsize, target_bytes=4 << 20):
    """Rows of the batch axis processed per grid step (~4 MiB input tile)."""
    bytes_per_row = T * D * itemsize
    rows = max(1, target_bytes // bytes_per_row)
    if rows >= B:
        if B >= 16:
            # Whole batch would fit in one tile: still split into >= 2
            # sublane-aligned blocks so v7x's two TensorCores both get work.
            return max(8, ((B + 1) // 2) // 8 * 8)
        return B                       # tiny batch: block dims == array dims
    if rows >= 8:
        return (rows // 8) * 8         # sublane-aligned (BLOCK_B, T) out block
    # T*D so large that <8 rows fit the budget; fall back to row-at-a-time.
    # TODO(synk): if even one (T, D) row exceeded VMEM, this would need an
    # online softmax with a second "arbitrary" grid axis over T.
    return rows


def classic_attention(inputs, w, *, block_b=None):
    """inputs: (B, T, D), w: (D,) -> (B, T) = softmax(tanh(inputs @ w), axis=1)."""
    B, T, D = inputs.shape
    assert w.shape == (D,)
    if block_b is None:
        block_b = _pick_block_b(B, T, D, inputs.dtype.itemsize)
    block_b = int(min(block_b, B))
    grid = (pl.cdiv(B, block_b),)      # partial last block: stores are clipped

    w2d = w.reshape(1, D)              # 2-D, lane-major layout for VMEM

    return pl.pallas_call(
        _attn_kernel,
        out_shape=jax.ShapeDtypeStruct((B, T), inputs.dtype),
        grid_spec=pltpu.PrefetchScalarGridSpec(
            num_scalar_prefetch=0,
            grid=grid,
            in_specs=[
                pl.BlockSpec((block_b, T, D), lambda b: (b, 0, 0)),
                # w stays resident in VMEM across all grid steps (no per-step DMA)
                pl.BlockSpec(memory_space=pltpu.MemorySpace.VMEM),
            ],
            out_specs=pl.BlockSpec((block_b, T), lambda b: (b, 0)),
        ),
        compiler_params=pltpu.CompilerParams(
            dimension_semantics=("parallel",)),
    )(inputs, w2d)


if __name__ == "__main__":
    B, T, D = 2, 8, 32   # batch, seq len, embed_dim
    key = jax.random.PRNGKey(0)
    k_x, k_w = jax.random.split(key)
    inputs = jax.random.normal(k_x, (B, T, D), dtype=jnp.float32)
    # deterministic parameter init (stand-in for torch.randn(embed_dim))
    w = jax.random.normal(k_w, (D,), dtype=jnp.float32)

    out = jax.block_until_ready(classic_attention(inputs, w))

    # sanity check vs. plain-JAX reference; tolerance accounts for the EUP
    # approximate reciprocal used for the softmax normalization.
    ref = jax.nn.softmax(jnp.tanh(jnp.einsum("btd,d->bt", inputs, w)), axis=1)
    assert out.shape == (B, T)
    assert jnp.allclose(out, ref, atol=5e-3, rtol=5e-3), float(
        jnp.max(jnp.abs(out - ref)))

    print("KERNEL_OK")
</pallas_src>

<mosaic_0001>
module attributes {stable_mosaic.version = 11 : i64} {
  func.func @_attn_kernel(%arg0: i32, %arg1: memref<2x8x32xf32, #tpu.memory_space<vmem>>, %arg2: memref<1x32xf32, #tpu.memory_space<vmem>>, %arg3: memref<2x8xf32, #tpu.memory_space<vmem>>) attributes {dimension_semantics = [#tpu.dimension_semantics<parallel>], iteration_bounds = array<i64: 1>, scalar_prefetch = 0 : i64, scratch_operands = 0 : i64, tpu.core_type = #tpu.core_type<tc>, window_params = [{transform_indices = @transform_0, window_bounds = array<i64: 2, 8, 32>}, {pipeline_mode = #tpu.pipeline_mode<synchronous>, transform_indices = @transform_1, window_bounds = array<i64: 1, 32>}, {transform_indices = @transform_2, window_bounds = array<i64: 2, 8>}]} {
    %c0 = arith.constant 0 : index
    %c0_0 = arith.constant 0 : index
    %c0_1 = arith.constant 0 : index
    %0 = vector.load %arg1[%c0, %c0_0, %c0_1] : memref<2x8x32xf32, #tpu.memory_space<vmem>>, vector<2x8x32xf32>
    %c0_2 = arith.constant 0 : index
    %c0_3 = arith.constant 0 : index
    %1 = vector.load %arg2[%c0_2, %c0_3] : memref<1x32xf32, #tpu.memory_space<vmem>>, vector<1x32xf32>
    %2 = vector.shape_cast %1 : vector<1x32xf32> to vector<1x1x32xf32>
    %3 = vector.broadcast %2 : vector<1x1x32xf32> to vector<2x8x32xf32>
    %4 = arith.mulf %0, %3 : vector<2x8x32xf32>
    %cst = arith.constant dense<0.000000e+00> : vector<2x8xf32>
    %5 = vector.multi_reduction <add>, %4, %cst [2] : vector<2x8x32xf32> to vector<2x8xf32>
    %6 = math.tanh %5 : vector<2x8xf32>
    %cst_4 = arith.constant dense<0xFF800000> : vector<2xf32>
    %7 = vector.multi_reduction <maximumf>, %6, %cst_4 [1] : vector<2x8xf32> to vector<2xf32>
    %8 = vector.shape_cast %7 : vector<2xf32> to vector<2x1xf32>
    %9 = vector.broadcast %8 : vector<2x1xf32> to vector<2x8xf32>
    %10 = arith.subf %6, %9 : vector<2x8xf32>
    %11 = math.exp %10 : vector<2x8xf32>
    %cst_5 = arith.constant dense<0.000000e+00> : vector<2xf32>
    %12 = vector.multi_reduction <add>, %11, %cst_5 [1] : vector<2x8xf32> to vector<2xf32>
    %13 = vector.shape_cast %12 : vector<2xf32> to vector<2x1xf32>
    %14 = tpu.reciprocal %13 {approx = true} : vector<2x1xf32> -> vector<2x1xf32>
    %15 = vector.broadcast %14 : vector<2x1xf32> to vector<2x8xf32>
    %16 = arith.mulf %11, %15 : vector<2x8xf32>
    %c0_6 = arith.constant 0 : index
    %c0_7 = arith.constant 0 : index
    %17 = vector.load %arg3[%c0_6, %c0_7] : memref<2x8xf32, #tpu.memory_space<vmem>>, vector<2x8xf32>
    tpu.vector_store %arg3[%c0_6, %c0_7], %16 {strides = array<i32>} : memref<2x8xf32, #tpu.memory_space<vmem>>, vector<2x8xf32>,
    return
  }
  func.func @transform_0(%arg0: i32) -> (i32, i32, i32) {
    %c0_i32 = arith.constant 0 : i32
    %c0_i32_0 = arith.constant 0 : i32
    %c0_i32_1 = arith.constant 0 : i32
    return %arg0, %c0_i32, %c0_i32_0 : i32, i32, i32
  }
  func.func @transform_1(%arg0: i32) -> (i32, i32) {
    %c0_i32 = arith.constant 0 : i32
    %c0_i32_0 = arith.constant 0 : i32
    %c0_i32_1 = arith.constant 0 : i32
    return %c0_i32, %c0_i32_0 : i32, i32
  }
  func.func @transform_2(%arg0: i32) -> (i32, i32) {
    %c0_i32 = arith.constant 0 : i32
    %c0_i32_0 = arith.constant 0 : i32
    return %arg0, %c0_i32 : i32, i32
  }
}

</mosaic_0001>

<bundles_post_ra>
// kernel: tpu_custom_call.1
= control target key start
LH: loop header
LB: loop body
LE: loop exit
PB: predicated region body
PF: predicated region fallthrough
CT: control target
= control target key end

     0   :  { %7 = vsyncpa [#allocation3], 0  ;;  %s248_s0 = inlined_call_operand.hbm [shape: f32[2,8,32], index: 0, kind: input, shape index: {}]   ;;  %s249_s1 = inlined_call_operand.vmem [shape: f32[1,32], index: 1, kind: input, shape index: {}]   ;;  %s250_s2 = inlined_call_operand.hbm [shape: f32[2,8], index: 2, kind: output, shape index: {}]  }
   0x1   :  { %8 = vsyncpa [#allocation4], 0  ;;  %s213_s9 = smov [#allocation2]  }
   0x2   :  { %s14_s10 = sshll.u32 %s213_s9, 4  ;;  %s15_s10 = int_to_ptr.vmem [resolvable:$true] %s14_s10 }
   0x3   :  { %s177_s11 = scalar_lea.vmem %s15_s10, 256  ;;  %p182_p1 = scmp.lt.s32.totalorder %s15_s10, %s15_s10 }
   0x4   :  { %p178_p0 = scmp.ne.s32.totalorder %s15_s10, %s177_s11  ;;  %p183_p2 = scmp.lt.s32.totalorder %s177_s11, %s177_s11 }
   0x6   :  { %p184_p3 = por %p183_p2, %p182_p1 }
   0x8   :  { %p185_p4 = pnand %p184_p3, %p178_p0 }
   0xa   :  { %188 = shalt.err (!%p185_p4)
}
   0xb   :  { %s214_s12 = smov 128   ;;  %s215_s13 = smov 8  }
   0xc   :  { %20 = dma.hbm_to_vmem [thread:$0]  %s248_s0, 256, %s15_s10, [#allocation3], %s214_s12, %s214_s12, %s215_s13  }
   0xd   :  { %209 = dma.done.wait [#allocation3], 256  }
   0xe   :  { %210 = vsyncadd [#allocation3], 4294967040  ;;  %v26_v0 = vld [vmem:[#allocation2] sm:$0xff]  ;;  %vm37_vm0 = vcmask 261120   ;;  %v27_v2 = vld [vmem:[#allocation2 + $0x8] sm:$0xff]  ;;  %v48_v9 = vlaneseq  ;;  %vm58_vm1 = vcmask 1041409  }
   0xf   :  { %v151_v1 = vld [vmem:[%s249_s1] ss:$0 sm:$0xff]  ;;  %vm61_vm2 = vcmask 58368   ;;  %v216_v19 = vmov 0   ;;  %s217_s0 = smov [#allocation5]  }
  0x10   :  { %v35_v3 = vmul.f32 %v151_v1, %v26_v0  ;;  %v36_v4 = vmul.f32 %v151_v1, %v27_v2  ;;  %v49_v10 = vand.u32 127, %v48_v9  ;;  %v51_v11 = vshrl.u32 %v48_v9, 7  ;;  %158 = vset.pattern.permute.xlu0 %v216_v19  ;;  %157 = vset.pattern.permute.xlu1 %v216_v19  ;;  %s142_s1 = sshll.u32 %s217_s0, 4  ;;  %s143_s1 = int_to_ptr.vmem [resolvable:$true] %s142_s1 }
  0x11   :  { %s189_s18 = scalar_lea.vmem %s143_s1, 32  ;;  %p194_p6 = scmp.lt.s32.totalorder %s143_s1, %s143_s1 }
  0x12   :  { %v38_v5 = vsel %vm37_vm0, %v35_v3, 0.0  ;;  %v41_v6 = vsel %vm37_vm0, %v36_v4, 0.0  ;;  %v52_v12 = vsub.s32 %v49_v10, %v51_v11  ;;  %v68_v20 = vsub.s32 0, %v51_v11  ;;  %p190_p5 = scmp.ne.s32.totalorder %s143_s1, %s189_s18  ;;  %p195_p7 = scmp.lt.s32.totalorder %s189_s18, %s189_s18 }
  0x13   :  { %39 = vadd.xlane.f32.xlu0 %v38_v5  ;;  %v72_v21 = vsub.s32 1, %v51_v11 }
  0x14   :  { %p196_p8 = por %p195_p7, %p194_p6 }
  0x16   :  { %p197_p9 = pnand %p196_p8, %p190_p5 }
  0x17   :  { %42 = vadd.xlane.f32.xlu0 %v41_v6 }
  0x9c   :  { %v40_v7 = vpop.xlane.xlu0 %39 }
  0x9d   :  { %159 = vtanh.f32 %v40_v7 }
  0xa0   :  { %v43_v8 = vpop.xlane.xlu0 %42 }
  0xa1   :  { %161 = vtanh.f32 %v43_v8 }
  0xaa   :  { %v160_v13 = vpop.eup %159 }
  0xab   :  { %v53_v15 = vrot.slane %v160_v13, %v52_v12 }
  0xae   :  { %v162_v14 = vpop.eup %161 }
  0xaf   :  { %v57_v16 = vrot.slane %v162_v14, %v52_v12 }
  0xb1   :  { %v59_v17 = vsel %vm58_vm1, %v57_v16, %v53_v15 }
  0xb2   :  { %v62_v18 = vsel %vm61_vm2, %v59_v17, -inf }
  0xb3   :  { %63 = vmax.xlane.f32.xlu1 %v62_v18 }
 0x13c   :  { %v64_v22 = vpop.xlane.xlu1 %63 }
 0x13d   :  { %v69_v23 = vrot.slane %v64_v22, %v68_v20  ;;  %v73_v24 = vrot.slane %v64_v22, %v72_v21 }
 0x13f   :  { %v76_v25 = vsub.f32 %v160_v13, %v69_v23  ;;  %v77_v26 = vsub.f32 %v162_v14, %v73_v24 }
 0x141   :  { %v78_v27 = vmul.f32 1.442695, %v76_v25  ;;  %v80_v28 = vmul.f32 1.442695, %v77_v26 }
 0x143   :  { %163 = vpow2.f32 %v78_v27 }
 0x144   :  { %165 = vpow2.f32 %v80_v28 }
 0x150   :  { %v164_v29 = vpop.eup %163 }
 0x151   :  { %v166_v30 = vpop.eup %165  ;;  %85 = vperm.xlu1 %157, %v164_v29  }
 0x152   :  { %88 = vperm.xlu0 %158, %v166_v30  }
 0x1cc   :  { %v86_v31 = vpop.permute.xlu1 %85 }
 0x1cd   :  { %v89_v32 = vpop.permute.xlu0 %88  ;;  %v93_v33 = vrot.slane %v86_v31, %v52_v12 }
 0x1ce   :  { %v97_v34 = vrot.slane %v89_v32, %v52_v12 }
 0x1d0   :  { %v98_v35 = vsel %vm58_vm1, %v97_v34, %v93_v33 }
 0x1d1   :  { %v100_v36 = vsel %vm61_vm2, %v98_v35, 0.0 }
 0x1d2   :  { %101 = vadd.xlane.f32.xlu1 %v100_v36 }
 0x25b   :  { %v102_v37 = vpop.xlane.xlu1 %101 }
 0x25c   :  { %167 = vrcp.f32 %v102_v37 }
 0x269   :  { %v168_v38 = vpop.eup %167 }
 0x26a   :  { %v108_v39 = vrot.slane %v168_v38, %v68_v20  ;;  %v112_v41 = vrot.slane %v168_v38, %v72_v21 }
 0x26c   :  { %v115_v40 = vmul.f32 %v164_v29, %v108_v39  ;;  %v116_v42 = vmul.f32 %v166_v30, %v112_v41 }
 0x26e   :  { %120 = vperm.xlu0 %158, %v115_v40  }
 0x272   :  { %123 = vperm.xlu0 %158, %v116_v42  }
 0x2e9   :  { %v121_v43 = vpop.permute.xlu0 %120 }
 0x2ea   :  { %v128_v45 = vrot.slane %v121_v43, %v52_v12 }
 0x2ed   :  { %v124_v44 = vpop.permute.xlu0 %123 }
 0x2ee   :  { %v132_v46 = vrot.slane %v124_v44, %v52_v12 }
 0x2f0   :  { %v133_v47 = vsel %vm58_vm1, %v132_v46, %v128_v45 }
 0x2f1   :  { %135 = vst.msk [vmem:[#allocation5] sm:$0x3] %vm61_vm2, %v133_v47 }
 0x2f2   :  { %200 = shalt.err (!%p197_p9)
}
 0x2f3   :  { %145 = dma.vmem_to_hbm [thread:$0]  %s143_s1, 32, %s250_s2, [#allocation4]  }
 0x2f4   :  { %211 = dma.done.wait [#allocation4], 32  }
 0x2f5   :  { %212 = vsyncadd [#allocation4], 4294967264 }
 0x2f6   :  { %149 = vsyncpa [#allocation3], 1 }
 0x2f7   :  { %150 = vsyncpa [#allocation4], 1 }

</bundles_post_ra>
